<compile_context>
chip_gen: v7x
topology: tpu7x:2x2x1
jax: 0.10.0
libtpu: 0.0.40
codegen_flags: <defaults>
</compile_context>

<pallas_src>
import jax
import jax.numpy as jnp
from jax.experimental import pallas as pl
from jax.experimental.pallas import tpu as pltpu

D_MODEL = 32
D_FF = 64
N_HEADS = 4
D_K = D_MODEL // N_HEADS
SEQ = 8
BATCH = 2
EPS = 1e-6


def _layernorm(x, alpha, bias):
    # Matches the custom LayerNormalization: alpha * (x - mean) / (std + eps) + bias
    # torch .std() default is unbiased (N-1 denominator).
    mean = jnp.mean(x, axis=-1, keepdims=True)
    var = jnp.sum((x - mean) ** 2, axis=-1, keepdims=True) / (x.shape[-1] - 1)
    return alpha * (x - mean) / (jnp.sqrt(var) + EPS) + bias


def encoder_block_kernel(x_ref, keep_ref, wbig_ref, w2_ref, vec_ref, o_ref):
    x = x_ref[...]        # (B*S, D)
    keep = keep_ref[...]  # (B*S, B*S) block-diagonal keep matrix (1.0 = attend)
    wbig = wbig_ref[...]  # (D, 3D + D + D_FF) = [wq | wk | wv | wo | w1]
    vec = vec_ref[...]    # (10, D_FF): rows = bq,bk,bv,bo,b1,b2,a1,g1,a2,g2 (zero padded)

    bq = vec[0:1, 0:D_MODEL]
    bk = vec[1:2, 0:D_MODEL]
    bv = vec[2:3, 0:D_MODEL]
    bo = vec[3:4, 0:D_MODEL]
    b1 = vec[4:5, 0:D_FF]
    b2 = vec[5:6, 0:D_MODEL]
    a1 = vec[6:7, 0:D_MODEL]
    g1 = vec[7:8, 0:D_MODEL]
    a2 = vec[8:9, 0:D_MODEL]
    g2 = vec[9:10, 0:D_MODEL]

    # Additive mask, hoisted out of the head loop (0 where attend, -1e9 where masked).
    neg = jnp.where(keep == 0.0, -1e9, 0.0)

    # ---------- residual connection 0: multi-head self-attention ----------
    xn = _layernorm(x, a1, g1)

    # Fused QKV projection: one (B*S, D) @ (D, 3D) matmul.
    qkv = jnp.dot(xn, wbig[:, 0:3 * D_MODEL], preferred_element_type=jnp.float32)
    scale = 1.0 / (D_K ** 0.5)
    q = (qkv[:, 0:D_MODEL] + bq) * scale          # pre-scale q once for all heads
    k = qkv[:, D_MODEL:2 * D_MODEL] + bk
    v = qkv[:, 2 * D_MODEL:3 * D_MODEL] + bv

    # Per-head attention (static 4-way unroll, all 2-D MXU dots).
    # concat_h(head_h) @ wo == sum_h head_h @ wo[h*D_K:(h+1)*D_K, :]  -> no concatenate.
    attn = jnp.zeros((x.shape[0], D_MODEL), jnp.float32)
    for h in range(N_HEADS):
        lo, hi = h * D_K, (h + 1) * D_K
        s = jnp.dot(q[:, lo:hi], k[:, lo:hi].T,
                    preferred_element_type=jnp.float32) + neg
        s = s - jnp.max(s, axis=-1, keepdims=True)
        p = jnp.exp(s)
        p = p * pl.reciprocal(jnp.sum(p, axis=-1, keepdims=True), approx=True)
        head = jnp.dot(p, v[:, lo:hi], preferred_element_type=jnp.float32)
        wo_h = wbig[lo:hi, 3 * D_MODEL:4 * D_MODEL]           # (D_K, D)
        attn = attn + jnp.dot(head, wo_h, preferred_element_type=jnp.float32)
    attn = attn + bo

    x1 = x + attn   # residual add (dropout omitted, eval mode)

    # ---------- residual connection 1: feed-forward ----------
    xn2 = _layernorm(x1, a2, g2)
    w1 = wbig[:, 4 * D_MODEL:4 * D_MODEL + D_FF]
    hid = jnp.maximum(jnp.dot(xn2, w1, preferred_element_type=jnp.float32) + b1, 0.0)
    ff = jnp.dot(hid, w2_ref[...], preferred_element_type=jnp.float32) + b2

    o_ref[...] = (x1 + ff).astype(o_ref.dtype)


def _pack_params(params):
    (wq, bq, wk, bk, wv, bv, wo, bo, a1, g1, w1, b1, w2, b2, a2, g2) = params
    # One weight slab: [wq | wk | wv | wo | w1] along the lane axis.
    wbig = jnp.concatenate([wq, wk, wv, wo, w1], axis=1)          # (D, 3D + D + D_FF)

    def row(p):
        p = p.reshape(1, -1)
        return jnp.pad(p, ((0, 0), (0, D_FF - p.shape[1])))

    vecs = jnp.concatenate([row(bq), row(bk), row(bv), row(bo),
                            row(b1), row(b2), row(a1), row(g1),
                            row(a2), row(g2)], axis=0)            # (10, D_FF)
    return wbig, w2, vecs


def _block_diag_keep(mask):
    # mask: (B, S, S) with 1.0 = attend.  Returns (B*S, B*S) keep matrix that is
    # block-diagonal in the batch (cross-batch positions are masked).
    B, S, _ = mask.shape
    eye = jnp.eye(B, dtype=mask.dtype)
    big = mask[:, :, None, :] * eye[:, None, :, None]             # (B, S, B, S)
    return big.reshape(B * S, B * S)


def encoder_block(x, mask, params):
    B, S, D = x.shape
    wbig, w2, vecs = _pack_params(params)
    xf = x.reshape(B * S, D)                 # fold batch into the M dimension
    keep = _block_diag_keep(mask)

    def full_block(shape):
        return pl.BlockSpec(shape, lambda i, _n=len(shape): (0,) * _n)

    out = pl.pallas_call(
        encoder_block_kernel,
        out_shape=jax.ShapeDtypeStruct((B * S, D), x.dtype),
        grid_spec=pltpu.PrefetchScalarGridSpec(
            num_scalar_prefetch=0,
            grid=(1,),                       # single step: whole block fits in VMEM
            in_specs=[full_block(xf.shape),
                      full_block(keep.shape),
                      full_block(wbig.shape),
                      full_block(w2.shape),
                      full_block(vecs.shape)],
            out_specs=full_block((B * S, D)),
        ),
        compiler_params=pltpu.CompilerParams(dimension_semantics=("arbitrary",)),
    )(xf, keep, wbig, w2, vecs)
    return out.reshape(B, S, D)


def reference(x, mask, params):
    (wq, bq, wk, bk, wv, bv, wo, bo, a1, g1, w1, b1, w2, b2, a2, g2) = params

    def ln(t, a, g):
        mean = t.mean(-1, keepdims=True)
        std = jnp.sqrt(((t - mean) ** 2).sum(-1, keepdims=True) / (t.shape[-1] - 1))
        return a * (t - mean) / (std + EPS) + g

    B, S, D = x.shape
    xn = ln(x, a1, g1)
    q = (xn @ wq + bq).reshape(B, S, N_HEADS, D_K).transpose(0, 2, 1, 3)
    k = (xn @ wk + bk).reshape(B, S, N_HEADS, D_K).transpose(0, 2, 1, 3)
    v = (xn @ wv + bv).reshape(B, S, N_HEADS, D_K).transpose(0, 2, 1, 3)
    scores = jnp.einsum("bhqd,bhkd->bhqk", q, k) / (D_K ** 0.5)
    scores = jnp.where(mask[:, None, :, :] == 0.0, -1e9, scores)
    p = jax.nn.softmax(scores, axis=-1)
    attn = jnp.einsum("bhqk,bhkd->bhqd", p, v).transpose(0, 2, 1, 3).reshape(B, S, D)
    x1 = x + (attn @ wo + bo)
    xn2 = ln(x1, a2, g2)
    ff = jnp.maximum(xn2 @ w1 + b1, 0.0) @ w2 + b2
    return x1 + ff


if __name__ == "__main__":
    key = jax.random.PRNGKey(0)
    ks = jax.random.split(key, 20)

    def init(k, shape, scale=0.05):
        return jax.random.normal(k, shape, jnp.float32) * scale

    wq = init(ks[0], (D_MODEL, D_MODEL)); bq = init(ks[1], (1, D_MODEL))
    wk = init(ks[2], (D_MODEL, D_MODEL)); bk = init(ks[3], (1, D_MODEL))
    wv = init(ks[4], (D_MODEL, D_MODEL)); bv = init(ks[5], (1, D_MODEL))
    wo = init(ks[6], (D_MODEL, D_MODEL)); bo = init(ks[7], (1, D_MODEL))
    a1 = jnp.ones((1, D_MODEL), jnp.float32); g1 = jnp.zeros((1, D_MODEL), jnp.float32)
    w1 = init(ks[8], (D_MODEL, D_FF));    b1 = init(ks[9], (1, D_FF))
    w2 = init(ks[10], (D_FF, D_MODEL));   b2 = init(ks[11], (1, D_MODEL))
    a2 = jnp.ones((1, D_MODEL), jnp.float32); g2 = jnp.zeros((1, D_MODEL), jnp.float32)

    params = [wq, bq, wk, bk, wv, bv, wo, bo, a1, g1, w1, b1, w2, b2, a2, g2]

    x = init(ks[12], (BATCH, SEQ, D_MODEL), scale=1.0)
    # causal-style mask just to exercise the masking path
    causal = (jnp.arange(SEQ)[None, :] <= jnp.arange(SEQ)[:, None]).astype(jnp.float32)
    mask = jnp.broadcast_to(causal, (BATCH, SEQ, SEQ))

    out = encoder_block(x, mask, params)
    out = jax.block_until_ready(out)

    ref = reference(x, mask, params)
    assert out.shape == ref.shape
    assert jnp.allclose(out, ref, atol=1e-3, rtol=1e-3), "mismatch vs pure-JAX reference"

    print("KERNEL_OK")
</pallas_src>

<mosaic_0001>
module attributes {stable_mosaic.version = 11 : i64} {
  func.func @encoder_block_kernel(%arg0: i32, %arg1: memref<16x32xf32, #tpu.memory_space<vmem>>, %arg2: memref<16x16xf32, #tpu.memory_space<vmem>>, %arg3: memref<32x192xf32, #tpu.memory_space<vmem>>, %arg4: memref<64x32xf32, #tpu.memory_space<vmem>>, %arg5: memref<10x64xf32, #tpu.memory_space<vmem>>, %arg6: memref<16x32xf32, #tpu.memory_space<vmem>>) attributes {dimension_semantics = [#tpu.dimension_semantics<arbitrary>], iteration_bounds = array<i64: 1>, scalar_prefetch = 0 : i64, scratch_operands = 0 : i64, tpu.core_type = #tpu.core_type<tc>, window_params = [{pipeline_mode = #tpu.pipeline_mode<synchronous>, transform_indices = @transform_0, window_bounds = array<i64: 16, 32>}, {pipeline_mode = #tpu.pipeline_mode<synchronous>, transform_indices = @transform_1, window_bounds = array<i64: 16, 16>}, {pipeline_mode = #tpu.pipeline_mode<synchronous>, transform_indices = @transform_2, window_bounds = array<i64: 32, 192>}, {pipeline_mode = #tpu.pipeline_mode<synchronous>, transform_indices = @transform_3, window_bounds = array<i64: 64, 32>}, {pipeline_mode = #tpu.pipeline_mode<synchronous>, transform_indices = @transform_4, window_bounds = array<i64: 10, 64>}, {pipeline_mode = #tpu.pipeline_mode<synchronous>, transform_indices = @transform_5, window_bounds = array<i64: 16, 32>}]} {
    %c0 = arith.constant 0 : index
    %c0_0 = arith.constant 0 : index
    %0 = vector.load %arg1[%c0, %c0_0] : memref<16x32xf32, #tpu.memory_space<vmem>>, vector<16x32xf32>
    %c0_1 = arith.constant 0 : index
    %c0_2 = arith.constant 0 : index
    %1 = vector.load %arg2[%c0_1, %c0_2] : memref<16x16xf32, #tpu.memory_space<vmem>>, vector<16x16xf32>
    %c0_3 = arith.constant 0 : index
    %c0_4 = arith.constant 0 : index
    %2 = vector.load %arg3[%c0_3, %c0_4] : memref<32x192xf32, #tpu.memory_space<vmem>>, vector<32x192xf32>
    %c0_5 = arith.constant 0 : index
    %c0_6 = arith.constant 0 : index
    %3 = vector.load %arg5[%c0_5, %c0_6] : memref<10x64xf32, #tpu.memory_space<vmem>>, vector<10x64xf32>
    %4 = vector.extract_strided_slice %3 {offsets = [0, 0], sizes = [1, 32], strides = [1, 1]} : vector<10x64xf32> to vector<1x32xf32>
    %5 = vector.extract_strided_slice %3 {offsets = [1, 0], sizes = [1, 32], strides = [1, 1]} : vector<10x64xf32> to vector<1x32xf32>
    %6 = vector.extract_strided_slice %3 {offsets = [2, 0], sizes = [1, 32], strides = [1, 1]} : vector<10x64xf32> to vector<1x32xf32>
    %7 = vector.extract_strided_slice %3 {offsets = [3, 0], sizes = [1, 32], strides = [1, 1]} : vector<10x64xf32> to vector<1x32xf32>
    %8 = vector.extract_strided_slice %3 {offsets = [4, 0], sizes = [1, 64], strides = [1, 1]} : vector<10x64xf32> to vector<1x64xf32>
    %9 = vector.extract_strided_slice %3 {offsets = [5, 0], sizes = [1, 32], strides = [1, 1]} : vector<10x64xf32> to vector<1x32xf32>
    %10 = vector.extract_strided_slice %3 {offsets = [6, 0], sizes = [1, 32], strides = [1, 1]} : vector<10x64xf32> to vector<1x32xf32>
    %11 = vector.extract_strided_slice %3 {offsets = [7, 0], sizes = [1, 32], strides = [1, 1]} : vector<10x64xf32> to vector<1x32xf32>
    %12 = vector.extract_strided_slice %3 {offsets = [8, 0], sizes = [1, 32], strides = [1, 1]} : vector<10x64xf32> to vector<1x32xf32>
    %13 = vector.extract_strided_slice %3 {offsets = [9, 0], sizes = [1, 32], strides = [1, 1]} : vector<10x64xf32> to vector<1x32xf32>
    %cst = arith.constant 0.000000e+00 : f32
    %14 = vector.broadcast %cst : f32 to vector<16x16xf32>
    %15 = arith.cmpf oeq, %1, %14 : vector<16x16xf32>
    %cst_7 = arith.constant -1.000000e+09 : f32
    %cst_8 = arith.constant 0.000000e+00 : f32
    %16 = vector.broadcast %cst_7 : f32 to vector<16x16xf32>
    %17 = vector.broadcast %cst_8 : f32 to vector<16x16xf32>
    %18 = arith.select %15, %16, %17 : vector<16x16xi1>, vector<16x16xf32>
    %cst_9 = arith.constant dense<0.000000e+00> : vector<16xf32>
    %19 = vector.multi_reduction <add>, %0, %cst_9 [1] : vector<16x32xf32> to vector<16xf32>
    %20 = vector.shape_cast %19 : vector<16xf32> to vector<16x1xf32>
    %cst_10 = arith.constant 3.200000e+01 : f32
    %21 = vector.broadcast %cst_10 : f32 to vector<16x1xf32>
    %22 = arith.divf %20, %21 : vector<16x1xf32>
    %23 = vector.broadcast %22 : vector<16x1xf32> to vector<16x32xf32>
    %24 = arith.subf %0, %23 : vector<16x32xf32>
    %25 = arith.mulf %24, %24 : vector<16x32xf32>
    %cst_11 = arith.constant dense<0.000000e+00> : vector<16xf32>
    %26 = vector.multi_reduction <add>, %25, %cst_11 [1] : vector<16x32xf32> to vector<16xf32>
    %27 = vector.shape_cast %26 : vector<16xf32> to vector<16x1xf32>
    %cst_12 = arith.constant 3.100000e+01 : f32
    %28 = vector.broadcast %cst_12 : f32 to vector<16x1xf32>
    %29 = arith.divf %27, %28 : vector<16x1xf32>
    %30 = vector.broadcast %22 : vector<16x1xf32> to vector<16x32xf32>
    %31 = arith.subf %0, %30 : vector<16x32xf32>
    %32 = vector.broadcast %10 : vector<1x32xf32> to vector<16x32xf32>
    %33 = arith.mulf %32, %31 : vector<16x32xf32>
    %34 = math.sqrt %29 : vector<16x1xf32>
    %cst_13 = arith.constant 9.99999997E-7 : f32
    %35 = vector.broadcast %cst_13 : f32 to vector<16x1xf32>
    %36 = arith.addf %34, %35 : vector<16x1xf32>
    %37 = vector.broadcast %36 : vector<16x1xf32> to vector<16x32xf32>
    %38 = arith.divf %33, %37 : vector<16x32xf32>
    %39 = vector.broadcast %11 : vector<1x32xf32> to vector<16x32xf32>
    %40 = arith.addf %38, %39 : vector<16x32xf32>
    %41 = vector.extract_strided_slice %2 {offsets = [0, 0], sizes = [32, 96], strides = [1, 1]} : vector<32x192xf32> to vector<32x96xf32>
    %cst_14 = arith.constant dense<0.000000e+00> : vector<16x96xf32>
    %42 = tpu.matmul %40, %41, %cst_14 {dimension_numbers = #tpu.dot_dimension_numbers<[1], [0], [0], [1], [0, 0, 1, 1], [], []>} : vector<16x32xf32>, vector<32x96xf32>, vector<16x96xf32> -> vector<16x96xf32>
    %43 = vector.extract_strided_slice %42 {offsets = [0, 0], sizes = [16, 32], strides = [1, 1]} : vector<16x96xf32> to vector<16x32xf32>
    %44 = vector.broadcast %4 : vector<1x32xf32> to vector<16x32xf32>
    %45 = arith.addf %43, %44 : vector<16x32xf32>
    %cst_15 = arith.constant 0.353553385 : f32
    %46 = vector.broadcast %cst_15 : f32 to vector<16x32xf32>
    %47 = arith.mulf %45, %46 : vector<16x32xf32>
    %48 = vector.extract_strided_slice %42 {offsets = [0, 32], sizes = [16, 32], strides = [1, 1]} : vector<16x96xf32> to vector<16x32xf32>
    %49 = vector.broadcast %5 : vector<1x32xf32> to vector<16x32xf32>
    %50 = arith.addf %48, %49 : vector<16x32xf32>
    %51 = vector.extract_strided_slice %42 {offsets = [0, 64], sizes = [16, 32], strides = [1, 1]} : vector<16x96xf32> to vector<16x32xf32>
    %52 = vector.broadcast %6 : vector<1x32xf32> to vector<16x32xf32>
    %53 = arith.addf %51, %52 : vector<16x32xf32>
    %cst_16 = arith.constant 0.000000e+00 : f32
    %54 = vector.broadcast %cst_16 : f32 to vector<16x32xf32>
    %55 = vector.extract_strided_slice %47 {offsets = [0, 0], sizes = [16, 8], strides = [1, 1]} : vector<16x32xf32> to vector<16x8xf32>
    %56 = vector.extract_strided_slice %50 {offsets = [0, 0], sizes = [16, 8], strides = [1, 1]} : vector<16x32xf32> to vector<16x8xf32>
    %57 = tpu.transpose %56, [1, 0] : vector<16x8xf32> -> vector<8x16xf32>
    %cst_17 = arith.constant dense<0.000000e+00> : vector<16x16xf32>
    %58 = tpu.matmul %55, %57, %cst_17 {dimension_numbers = #tpu.dot_dimension_numbers<[1], [0], [0], [1], [0, 0, 1, 1], [], []>} : vector<16x8xf32>, vector<8x16xf32>, vector<16x16xf32> -> vector<16x16xf32>
    %59 = arith.addf %58, %18 : vector<16x16xf32>
    %cst_18 = arith.constant dense<0xFF800000> : vector<16xf32>
    %60 = vector.multi_reduction <maximumf>, %59, %cst_18 [1] : vector<16x16xf32> to vector<16xf32>
    %61 = vector.shape_cast %60 : vector<16xf32> to vector<16x1xf32>
    %62 = vector.broadcast %61 : vector<16x1xf32> to vector<16x16xf32>
    %63 = arith.subf %59, %62 : vector<16x16xf32>
    %64 = math.exp %63 : vector<16x16xf32>
    %cst_19 = arith.constant dense<0.000000e+00> : vector<16xf32>
    %65 = vector.multi_reduction <add>, %64, %cst_19 [1] : vector<16x16xf32> to vector<16xf32>
    %66 = vector.shape_cast %65 : vector<16xf32> to vector<16x1xf32>
    %67 = tpu.reciprocal %66 {approx = true} : vector<16x1xf32> -> vector<16x1xf32>
    %68 = vector.broadcast %67 : vector<16x1xf32> to vector<16x16xf32>
    %69 = arith.mulf %64, %68 : vector<16x16xf32>
    %70 = vector.extract_strided_slice %53 {offsets = [0, 0], sizes = [16, 8], strides = [1, 1]} : vector<16x32xf32> to vector<16x8xf32>
    %cst_20 = arith.constant dense<0.000000e+00> : vector<16x8xf32>
    %71 = tpu.matmul %69, %70, %cst_20 {dimension_numbers = #tpu.dot_dimension_numbers<[1], [0], [0], [1], [0, 0, 1, 1], [], []>} : vector<16x16xf32>, vector<16x8xf32>, vector<16x8xf32> -> vector<16x8xf32>
    %72 = vector.extract_strided_slice %2 {offsets = [0, 96], sizes = [8, 32], strides = [1, 1]} : vector<32x192xf32> to vector<8x32xf32>
    %cst_21 = arith.constant dense<0.000000e+00> : vector<16x32xf32>
    %73 = tpu.matmul %71, %72, %cst_21 {dimension_numbers = #tpu.dot_dimension_numbers<[1], [0], [0], [1], [0, 0, 1, 1], [], []>} : vector<16x8xf32>, vector<8x32xf32>, vector<16x32xf32> -> vector<16x32xf32>
    %74 = arith.addf %54, %73 : vector<16x32xf32>
    %75 = vector.extract_strided_slice %47 {offsets = [0, 8], sizes = [16, 8], strides = [1, 1]} : vector<16x32xf32> to vector<16x8xf32>
    %76 = vector.extract_strided_slice %50 {offsets = [0, 8], sizes = [16, 8], strides = [1, 1]} : vector<16x32xf32> to vector<16x8xf32>
    %77 = tpu.transpose %76, [1, 0] : vector<16x8xf32> -> vector<8x16xf32>
    %cst_22 = arith.constant dense<0.000000e+00> : vector<16x16xf32>
    %78 = tpu.matmul %75, %77, %cst_22 {dimension_numbers = #tpu.dot_dimension_numbers<[1], [0], [0], [1], [0, 0, 1, 1], [], []>} : vector<16x8xf32>, vector<8x16xf32>, vector<16x16xf32> -> vector<16x16xf32>
    %79 = arith.addf %78, %18 : vector<16x16xf32>
    %cst_23 = arith.constant dense<0xFF800000> : vector<16xf32>
    %80 = vector.multi_reduction <maximumf>, %79, %cst_23 [1] : vector<16x16xf32> to vector<16xf32>
    %81 = vector.shape_cast %80 : vector<16xf32> to vector<16x1xf32>
    %82 = vector.broadcast %81 : vector<16x1xf32> to vector<16x16xf32>
    %83 = arith.subf %79, %82 : vector<16x16xf32>
    %84 = math.exp %83 : vector<16x16xf32>
    %cst_24 = arith.constant dense<0.000000e+00> : vector<16xf32>
    %85 = vector.multi_reduction <add>, %84, %cst_24 [1] : vector<16x16xf32> to vector<16xf32>
    %86 = vector.shape_cast %85 : vector<16xf32> to vector<16x1xf32>
    %87 = tpu.reciprocal %86 {approx = true} : vector<16x1xf32> -> vector<16x1xf32>
    %88 = vector.broadcast %87 : vector<16x1xf32> to vector<16x16xf32>
    %89 = arith.mulf %84, %88 : vector<16x16xf32>
    %90 = vector.extract_strided_slice %53 {offsets = [0, 8], sizes = [16, 8], strides = [1, 1]} : vector<16x32xf32> to vector<16x8xf32>
    %cst_25 = arith.constant dense<0.000000e+00> : vector<16x8xf32>
    %91 = tpu.matmul %89, %90, %cst_25 {dimension_numbers = #tpu.dot_dimension_numbers<[1], [0], [0], [1], [0, 0, 1, 1], [], []>} : vector<16x16xf32>, vector<16x8xf32>, vector<16x8xf32> -> vector<16x8xf32>
    %92 = vector.extract_strided_slice %2 {offsets = [8, 96], sizes = [8, 32], strides = [1, 1]} : vector<32x192xf32> to vector<8x32xf32>
    %cst_26 = arith.constant dense<0.000000e+00> : vector<16x32xf32>
    %93 = tpu.matmul %91, %92, %cst_26 {dimension_numbers = #tpu.dot_dimension_numbers<[1], [0], [0], [1], [0, 0, 1, 1], [], []>} : vector<16x8xf32>, vector<8x32xf32>, vector<16x32xf32> -> vector<16x32xf32>
    %94 = arith.addf %74, %93 : vector<16x32xf32>
    %95 = vector.extract_strided_slice %47 {offsets = [0, 16], sizes = [16, 8], strides = [1, 1]} : vector<16x32xf32> to vector<16x8xf32>
    %96 = vector.extract_strided_slice %50 {offsets = [0, 16], sizes = [16, 8], strides = [1, 1]} : vector<16x32xf32> to vector<16x8xf32>
    %97 = tpu.transpose %96, [1, 0] : vector<16x8xf32> -> vector<8x16xf32>
    %cst_27 = arith.constant dense<0.000000e+00> : vector<16x16xf32>
    %98 = tpu.matmul %95, %97, %cst_27 {dimension_numbers = #tpu.dot_dimension_numbers<[1], [0], [0], [1], [0, 0, 1, 1], [], []>} : vector<16x8xf32>, vector<8x16xf32>, vector<16x16xf32> -> vector<16x16xf32>
    %99 = arith.addf %98, %18 : vector<16x16xf32>
    %cst_28 = arith.constant dense<0xFF800000> : vector<16xf32>
    %100 = vector.multi_reduction <maximumf>, %99, %cst_28 [1] : vector<16x16xf32> to vector<16xf32>
    %101 = vector.shape_cast %100 : vector<16xf32> to vector<16x1xf32>
    %102 = vector.broadcast %101 : vector<16x1xf32> to vector<16x16xf32>
    %103 = arith.subf %99, %102 : vector<16x16xf32>
    %104 = math.exp %103 : vector<16x16xf32>
    %cst_29 = arith.constant dense<0.000000e+00> : vector<16xf32>
    %105 = vector.multi_reduction <add>, %104, %cst_29 [1] : vector<16x16xf32> to vector<16xf32>
    %106 = vector.shape_cast %105 : vector<16xf32> to vector<16x1xf32>
    %107 = tpu.reciprocal %106 {approx = true} : vector<16x1xf32> -> vector<16x1xf32>
    %108 = vector.broadcast %107 : vector<16x1xf32> to vector<16x16xf32>
    %109 = arith.mulf %104, %108 : vector<16x16xf32>
    %110 = vector.extract_strided_slice %53 {offsets = [0, 16], sizes = [16, 8], strides = [1, 1]} : vector<16x32xf32> to vector<16x8xf32>
    %cst_30 = arith.constant dense<0.000000e+00> : vector<16x8xf32>
    %111 = tpu.matmul %109, %110, %cst_30 {dimension_numbers = #tpu.dot_dimension_numbers<[1], [0], [0], [1], [0, 0, 1, 1], [], []>} : vector<16x16xf32>, vector<16x8xf32>, vector<16x8xf32> -> vector<16x8xf32>
    %112 = vector.extract_strided_slice %2 {offsets = [16, 96], sizes = [8, 32], strides = [1, 1]} : vector<32x192xf32> to vector<8x32xf32>
    %cst_31 = arith.constant dense<0.000000e+00> : vector<16x32xf32>
    %113 = tpu.matmul %111, %112, %cst_31 {dimension_numbers = #tpu.dot_dimension_numbers<[1], [0], [0], [1], [0, 0, 1, 1], [], []>} : vector<16x8xf32>, vector<8x32xf32>, vector<16x32xf32> -> vector<16x32xf32>
    %114 = arith.addf %94, %113 : vector<16x32xf32>
    %115 = vector.extract_strided_slice %47 {offsets = [0, 24], sizes = [16, 8], strides = [1, 1]} : vector<16x32xf32> to vector<16x8xf32>
    %116 = vector.extract_strided_slice %50 {offsets = [0, 24], sizes = [16, 8], strides = [1, 1]} : vector<16x32xf32> to vector<16x8xf32>
    %117 = tpu.transpose %116, [1, 0] : vector<16x8xf32> -> vector<8x16xf32>
    %cst_32 = arith.constant dense<0.000000e+00> : vector<16x16xf32>
    %118 = tpu.matmul %115, %117, %cst_32 {dimension_numbers = #tpu.dot_dimension_numbers<[1], [0], [0], [1], [0, 0, 1, 1], [], []>} : vector<16x8xf32>, vector<8x16xf32>, vector<16x16xf32> -> vector<16x16xf32>
    %119 = arith.addf %118, %18 : vector<16x16xf32>
    %cst_33 = arith.constant dense<0xFF800000> : vector<16xf32>
    %120 = vector.multi_reduction <maximumf>, %119, %cst_33 [1] : vector<16x16xf32> to vector<16xf32>
    %121 = vector.shape_cast %120 : vector<16xf32> to vector<16x1xf32>
    %122 = vector.broadcast %121 : vector<16x1xf32> to vector<16x16xf32>
    %123 = arith.subf %119, %122 : vector<16x16xf32>
    %124 = math.exp %123 : vector<16x16xf32>
    %cst_34 = arith.constant dense<0.000000e+00> : vector<16xf32>
    %125 = vector.multi_reduction <add>, %124, %cst_34 [1] : vector<16x16xf32> to vector<16xf32>
    %126 = vector.shape_cast %125 : vector<16xf32> to vector<16x1xf32>
    %127 = tpu.reciprocal %126 {approx = true} : vector<16x1xf32> -> vector<16x1xf32>
    %128 = vector.broadcast %127 : vector<16x1xf32> to vector<16x16xf32>
    %129 = arith.mulf %124, %128 : vector<16x16xf32>
    %130 = vector.extract_strided_slice %53 {offsets = [0, 24], sizes = [16, 8], strides = [1, 1]} : vector<16x32xf32> to vector<16x8xf32>
    %cst_35 = arith.constant dense<0.000000e+00> : vector<16x8xf32>
    %131 = tpu.matmul %129, %130, %cst_35 {dimension_numbers = #tpu.dot_dimension_numbers<[1], [0], [0], [1], [0, 0, 1, 1], [], []>} : vector<16x16xf32>, vector<16x8xf32>, vector<16x8xf32> -> vector<16x8xf32>
    %132 = vector.extract_strided_slice %2 {offsets = [24, 96], sizes = [8, 32], strides = [1, 1]} : vector<32x192xf32> to vector<8x32xf32>
    %cst_36 = arith.constant dense<0.000000e+00> : vector<16x32xf32>
    %133 = tpu.matmul %131, %132, %cst_36 {dimension_numbers = #tpu.dot_dimension_numbers<[1], [0], [0], [1], [0, 0, 1, 1], [], []>} : vector<16x8xf32>, vector<8x32xf32>, vector<16x32xf32> -> vector<16x32xf32>
    %134 = arith.addf %114, %133 : vector<16x32xf32>
    %135 = vector.broadcast %7 : vector<1x32xf32> to vector<16x32xf32>
    %136 = arith.addf %134, %135 : vector<16x32xf32>
    %137 = arith.addf %0, %136 : vector<16x32xf32>
    %cst_37 = arith.constant dense<0.000000e+00> : vector<16xf32>
    %138 = vector.multi_reduction <add>, %137, %cst_37 [1] : vector<16x32xf32> to vector<16xf32>
    %139 = vector.shape_cast %138 : vector<16xf32> to vector<16x1xf32>
    %cst_38 = arith.constant 3.200000e+01 : f32
    %140 = vector.broadcast %cst_38 : f32 to vector<16x1xf32>
    %141 = arith.divf %139, %140 : vector<16x1xf32>
    %142 = vector.broadcast %141 : vector<16x1xf32> to vector<16x32xf32>
    %143 = arith.subf %137, %142 : vector<16x32xf32>
    %144 = arith.mulf %143, %143 : vector<16x32xf32>
    %cst_39 = arith.constant dense<0.000000e+00> : vector<16xf32>
    %145 = vector.multi_reduction <add>, %144, %cst_39 [1] : vector<16x32xf32> to vector<16xf32>
    %146 = vector.shape_cast %145 : vector<16xf32> to vector<16x1xf32>
    %cst_40 = arith.constant 3.100000e+01 : f32
    %147 = vector.broadcast %cst_40 : f32 to vector<16x1xf32>
    %148 = arith.divf %146, %147 : vector<16x1xf32>
    %149 = vector.broadcast %141 : vector<16x1xf32> to vector<16x32xf32>
    %150 = arith.subf %137, %149 : vector<16x32xf32>
    %151 = vector.broadcast %12 : vector<1x32xf32> to vector<16x32xf32>
    %152 = arith.mulf %151, %150 : vector<16x32xf32>
    %153 = math.sqrt %148 : vector<16x1xf32>
    %cst_41 = arith.constant 9.99999997E-7 : f32
    %154 = vector.broadcast %cst_41 : f32 to vector<16x1xf32>
    %155 = arith.addf %153, %154 : vector<16x1xf32>
    %156 = vector.broadcast %155 : vector<16x1xf32> to vector<16x32xf32>
    %157 = arith.divf %152, %156 : vector<16x32xf32>
    %158 = vector.broadcast %13 : vector<1x32xf32> to vector<16x32xf32>
    %159 = arith.addf %157, %158 : vector<16x32xf32>
    %160 = vector.extract_strided_slice %2 {offsets = [0, 128], sizes = [32, 64], strides = [1, 1]} : vector<32x192xf32> to vector<32x64xf32>
    %cst_42 = arith.constant dense<0.000000e+00> : vector<16x64xf32>
    %161 = tpu.matmul %159, %160, %cst_42 {dimension_numbers = #tpu.dot_dimension_numbers<[1], [0], [0], [1], [0, 0, 1, 1], [], []>} : vector<16x32xf32>, vector<32x64xf32>, vector<16x64xf32> -> vector<16x64xf32>
    %162 = vector.broadcast %8 : vector<1x64xf32> to vector<16x64xf32>
    %163 = arith.addf %161, %162 : vector<16x64xf32>
    %cst_43 = arith.constant 0.000000e+00 : f32
    %164 = vector.broadcast %cst_43 : f32 to vector<16x64xf32>
    %165 = arith.maximumf %163, %164 : vector<16x64xf32>
    %c0_44 = arith.constant 0 : index
    %c0_45 = arith.constant 0 : index
    %166 = vector.load %arg4[%c0_44, %c0_45] : memref<64x32xf32, #tpu.memory_space<vmem>>, vector<64x32xf32>
    %cst_46 = arith.constant dense<0.000000e+00> : vector<16x32xf32>
    %167 = tpu.matmul %165, %166, %cst_46 {dimension_numbers = #tpu.dot_dimension_numbers<[1], [0], [0], [1], [0, 0, 1, 1], [], []>} : vector<16x64xf32>, vector<64x32xf32>, vector<16x32xf32> -> vector<16x32xf32>
    %168 = vector.broadcast %9 : vector<1x32xf32> to vector<16x32xf32>
    %169 = arith.addf %167, %168 : vector<16x32xf32>
    %170 = arith.addf %137, %169 : vector<16x32xf32>
    %c0_47 = arith.constant 0 : index
    %c0_48 = arith.constant 0 : index
    %171 = vector.load %arg6[%c0_47, %c0_48] : memref<16x32xf32, #tpu.memory_space<vmem>>, vector<16x32xf32>
    tpu.vector_store %arg6[%c0_47, %c0_48], %170 {strides = array<i32>} : memref<16x32xf32, #tpu.memory_space<vmem>>, vector<16x32xf32>,
    return
  }
  func.func @transform_0(%arg0: i32) -> (i32, i32) {
    %c0_i32 = arith.constant 0 : i32
    %c0_i32_0 = arith.constant 0 : i32
    %c0_i32_1 = arith.constant 0 : i32
    return %c0_i32, %c0_i32_0 : i32, i32
  }
  func.func @transform_1(%arg0: i32) -> (i32, i32) {
    %c0_i32 = arith.constant 0 : i32
    %c0_i32_0 = arith.constant 0 : i32
    %c0_i32_1 = arith.constant 0 : i32
    return %c0_i32, %c0_i32_0 : i32, i32
  }
  func.func @transform_2(%arg0: i32) -> (i32, i32) {
    %c0_i32 = arith.constant 0 : i32
    %c0_i32_0 = arith.constant 0 : i32
    %c0_i32_1 = arith.constant 0 : i32
    return %c0_i32, %c0_i32_0 : i32, i32
  }
  func.func @transform_3(%arg0: i32) -> (i32, i32) {
    %c0_i32 = arith.constant 0 : i32
    %c0_i32_0 = arith.constant 0 : i32
    %c0_i32_1 = arith.constant 0 : i32
    return %c0_i32, %c0_i32_0 : i32, i32
  }
  func.func @transform_4(%arg0: i32) -> (i32, i32) {
    %c0_i32 = arith.constant 0 : i32
    %c0_i32_0 = arith.constant 0 : i32
    %c0_i32_1 = arith.constant 0 : i32
    return %c0_i32, %c0_i32_0 : i32, i32
  }
  func.func @transform_5(%arg0: i32) -> (i32, i32) {
    %c0_i32 = arith.constant 0 : i32
    %c0_i32_0 = arith.constant 0 : i32
    %c0_i32_1 = arith.constant 0 : i32
    return %c0_i32, %c0_i32_0 : i32, i32
  }
}

</mosaic_0001>

<bundles_post_ra>
// kernel: tpu_custom_call.1
= control target key start
LH: loop header
LB: loop body
LE: loop exit
PB: predicated region body
PF: predicated region fallthrough
CT: control target
= control target key end

     0   :  { %10 = vsyncpa [#allocation3], 0  ;;  %s2413_s0 = inlined_call_operand.vmem [shape: f32[16,32], index: 0, kind: input, shape index: {}]   ;;  %s2414_s1 = inlined_call_operand.vmem [shape: f32[16,16], index: 1, kind: input, shape index: {}]   ;;  %s2415_s2 = inlined_call_operand.vmem [shape: f32[32,192], index: 2, kind: input, shape index: {}]   ;;  %s2416_s3 = inlined_call_operand.vmem [shape: f32[64,32], index: 3, kind: input, shape index: {}]   ;;  %s2417_s4 = inlined_call_operand.hbm [shape: f32[10,64], index: 4, kind: input, shape index: {}]   ;;  %s2418_s5 = inlined_call_operand.hbm [shape: f32[16,32], index: 5, kind: output, shape index: {}]  }
   0x1   :  { %11 = vsyncpa [#allocation4], 0  ;;  %s2079_s18 = smov [#allocation2]   ;;  %s2031_s22 = scalar_lea.hbm %s2417_s4, 256 }
   0x2   :  { %s25_s19 = sshll.u32 %s2079_s18, 4  ;;  %p2032_p0 = scmp.ne.s32.totalorder %s2417_s4, %s2031_s22  ;;  %s26_s19 = int_to_ptr.vmem [resolvable:$true] %s25_s19 }
   0x3   :  { %p2035_p1 = scmp.lt.u32.totalorder %s2031_s22, %s2417_s4 }
   0x5   :  { %p2037_p2 = pnand %p2035_p1, %p2032_p0 }
   0x7   :  { %2040 = shalt.err (!%p2037_p2)
}
   0x8   :  { %s2041_s27 = scalar_lea.vmem %s26_s19, 256  ;;  %p2046_p4 = scmp.lt.s32.totalorder %s26_s19, %s26_s19 }
   0x9   :  { %p2042_p3 = scmp.ne.s32.totalorder %s26_s19, %s2041_s27  ;;  %p2047_p5 = scmp.lt.s32.totalorder %s2041_s27, %s2041_s27 }
   0xb   :  { %p2048_p6 = por %p2047_p5, %p2046_p4 }
   0xd   :  { %p2049_p7 = pnand %p2048_p6, %p2042_p3 }
   0xf   :  { %2052 = shalt.err (!%p2049_p7)
}
  0x10   :  { %s2080_s28 = smov 128   ;;  %s2081_s29 = smov 8  }
  0x11   :  { %31 = dma.hbm_to_vmem [thread:$0]  %s2417_s4, 256, %s26_s19, [#allocation3], %s2080_s28, %s2080_s28, %s2081_s29  }
  0x12   :  { %2075 = dma.done.wait [#allocation3], 256  }
  0x13   :  { %2076 = vsyncadd [#allocation3], 4294967040  ;;  %vm53_vm0 = vcmask 261120   ;;  %v2144_v0 = vld [vmem:[%s2413_s0] sm:$0xff]  ;;  %v2149_v1 = vld [vmem:[%s2413_s0 + $0x8] sm:$0xff]  ;;  %v76_v20 = vlaneseq  ;;  %s2082_s17 = smov 32  }
  0x14   :  { %v54_v2 = vsel %vm53_vm0, %v2144_v0, 0.0  ;;  %v57_v3 = vsel %vm53_vm0, %v2149_v1, 0.0  ;;  %v2162_v14 = vld [vmem:[%s2415_s2] sm:$0xff]  ;;  %v2167_v15 = vld [vmem:[%s2415_s2 + $0x10] sm:$0xff]  ;;  %vm223_vm5 = vcmask 64512   ;;  %s2083_s18 = smov 120  }
  0x15   :  { %55 = vadd.xlane.f32.xlu0 %v54_v2  ;;  %v2172_v16 = vld [vmem:[%s2415_s2 + $0x20] sm:$0xff]  ;;  %v1848_v17 = vpack.c.bf16 %v2167_v15, %v2162_v14  ;;  %v2179_v18 = vld [vmem:[%s2415_s2 + $0x30] sm:$0xff]  ;;  %v2183_v21 = vshrl.u32 %v76_v20, 7  ;;  %s2084_s19 = smov 96   ;;  %s2085_s20 = smov 112   ;;  %vm2227_vm6 = vmpackc.low %vm223_vm5, %vm223_vm5  ;;  %vm309_vm9 = vcmask 130048  }
  0x16   :  { %v1852_v19 = vpack.c.bf16 %v2179_v18, %v2172_v16  ;;  %v2186_v23 = vld [vmem:[#allocation2] sm:$0xff]  ;;  %s2086_s21 = smov 88   ;;  %s2087_s22 = smov 80   ;;  %vm1524_vm14 = vcmask 523264  }
  0x17   :  { %1849 = vmatprep.subr.bf16.mxu1 %v1848_v17  ;;  %v199_v22 = vsub.s32 1, %v2183_v21  ;;  %v78_v39 = vsub.s32 6, %v2183_v21  ;;  %v104_v43 = vsub.s32 7, %v2183_v21  ;;  %v191_v53 = vsub.s32 0, %v2183_v21  ;;  %s2090_s27 = smov 56   ;;  %s2091_s30 = smov 72  }
  0x18   :  { %1851 = vmatpush3.bf16.msra.mxu1 %v1848_v17  ;;  %s2092_s6 = smov 104   ;;  %s2093_s7 = smov 48  }
  0x19   :  { %58 = vadd.xlane.f32.xlu0 %v57_v3  ;;  %1853 = vmatprep.subr.bf16.mxu1 %v1852_v19  ;;  %v200_v24 = vrot.slane %v2186_v23, %v199_v22  ;;  %v79_v42 = vrot.slane %v2186_v23, %v78_v39  ;;  %v105_v45 = vrot.slane %v2186_v23, %v104_v43  ;;  %s2094_s8 = smov 40  }
  0x1a   :  { %v192_v54 = vrot.slane %v2186_v23, %v191_v53 }
  0x1c   :  { %1855 = vmatpush3.bf16.msra.mxu1 %v1852_v19 }
  0x2f   :  { %202 = vrot.lane.b32.xlu0 %v200_v24, %s2082_s17 }
  0xa2   :  { %v56_v4 = vpop.xlane.xlu0 %55 }
  0xa3   :  { %v61_v5 = vmul.f32 0.03125, %v56_v4 }
  0xa5   :  { %v63_v6 = vsub.f32 %v2144_v0, %v61_v5 }
  0xa6   :  { %v59_v7 = vpop.xlane.xlu0 %58 }
  0xa7   :  { %v62_v8 = vmul.f32 0.03125, %v59_v7  ;;  %v65_v9 = vmul.f32 %v63_v6, %v63_v6  ;;  %v80_v44 = vmul.f32 %v79_v42, %v63_v6 }
  0xa9   :  { %v64_v10 = vsub.f32 %v2149_v1, %v62_v8  ;;  %v67_v11 = vsel %vm53_vm0, %v65_v9, 0.0 }
  0xaa   :  { %68 = vadd.xlane.f32.xlu1 %v67_v11  ;;  %v203_v55 = vpop.permute.xlu0 %202 }
  0xab   :  { %v66_v12 = vmul.f32 %v64_v10, %v64_v10  ;;  %v81_v48 = vmul.f32 %v79_v42, %v64_v10 }
  0xad   :  { %v70_v13 = vsel %vm53_vm0, %v66_v12, 0.0 }
  0xae   :  { %71 = vadd.xlane.f32.xlu1 %v70_v13 }
 0x137   :  { %v69_v25 = vpop.xlane.xlu1 %68 }
 0x138   :  { %v74_v26 = vmul.f32 0.032258064, %v69_v25 }
 0x13a   :  { %1983 = vrsqrt.f32 %v74_v26  ;;  %vm84_vm1 = vcmp.eq.f32.partialorder %v74_v26, inf  ;;  %v87_v31 = vand.u32 2147483648, %v74_v26  ;;  %vm86_vm2 = vcmp.eq.f32.partialorder %v74_v26, 0.0 }
 0x13b   :  { %v72_v27 = vpop.xlane.xlu1 %71 }
 0x13c   :  { %v75_v28 = vmul.f32 0.032258064, %v72_v27  ;;  %v38_v27 = vld [vmem:[%s2414_s1 + $0x8] sm:$0xff] }
 0x13d   :  { %vm50_vm7 = vcmp.eq.f32.partialorder %v38_v27, 0.0 }
 0x13e   :  { %1985 = vrsqrt.f32 %v75_v28  ;;  %vm91_vm3 = vcmp.eq.f32.partialorder %v75_v28, inf  ;;  %v94_v37 = vand.u32 2147483648, %v75_v28  ;;  %vm93_vm4 = vcmp.eq.f32.partialorder %v75_v28, 0.0 }
 0x144   :  { %v1984_v29 = vpop.eup %1983 }
 0x145   :  { %v83_v30 = vmul.f32 %v1984_v29, %v74_v26  ;;  %v2088_v29 = vmov 0.0  }
 0x147   :  { %v85_v32 = vsel %vm84_vm1, %v74_v26, %v83_v30  ;;  %v2255_v30 = vsel %vm50_vm7, -1e+09, %v2088_v29 }
 0x148   :  { %v1986_v33 = vpop.eup %1985  ;;  %v88_v34 = vsel %vm86_vm2, %v87_v31, %v85_v32 }
 0x149   :  { %v90_v35 = vmul.f32 %v1986_v33, %v75_v28  ;;  %v96_v36 = vadd.f32 1e-06, %v88_v34 }
 0x14b   :  { %v92_v38 = vsel %vm91_vm3, %v75_v28, %v90_v35  ;;  %1987 = vrcp.f32 %v96_v36  ;;  %v37_v28 = vld [vmem:[%s2414_s1] sm:$0xff]  ;;  %s2089_s1 = smov 64  }
 0x14c   :  { %v95_v40 = vsel %vm93_vm4, %v94_v37, %v92_v38  ;;  %vm49_vm8 = vcmp.eq.f32.partialorder %v37_v28, 0.0 }
 0x14d   :  { %v97_v41 = vadd.f32 1e-06, %v95_v40  ;;  %v2257_v31 = vsel %vm49_vm8, -1e+09, %v2088_v29 }
 0x14f   :  { %1989 = vrcp.f32 %v97_v41 }
 0x155   :  { %v1988_v46 = vpop.eup %1987 }
 0x156   :  { %v99_v47 = vmul.f32 %v1988_v46, %v80_v44  ;;  %v209_v46 = vsub.s32 2, %v2183_v21 }
 0x158   :  { %v106_v49 = vadd.f32 %v105_v45, %v99_v47  ;;  %v210_v47 = vrot.slane %v2186_v23, %v209_v46 }
 0x159   :  { %v1990_v50 = vpop.eup %1989 }
 0x15a   :  { %v101_v51 = vmul.f32 %v1990_v50, %v81_v48  ;;  %1739 = vmatprep.mubr.msk.f32.mxu1 %vm53_vm0, %v106_v49 }
 0x15c   :  { %v107_v52 = vadd.f32 %v105_v45, %v101_v51 }
 0x15e   :  { %1740 = vmatmul.mubr.msk.f32.vlgmr.msra.gmra.mrb[0].mxu1 %vm53_vm0, %v107_v52 }
 0x231   :  { %v2202_v56 = vpop.f32.mrb[0].mxu1 }
 0x232   :  { %v194_v57 = vadd.f32 %v2202_v56, %v192_v54  ;;  %v206_v58 = vadd.f32 %v2202_v56, %v203_v55  ;;  %v2206_v59 = vpop.f32.mrb[1].mxu1 }
 0x233   :  { %v193_v60 = vadd.f32 %v192_v54, %v2206_v59  ;;  %v205_v61 = vadd.f32 %v203_v55, %v2206_v59 }
 0x234   :  { %v2210_v62 = vmul.f32 0.35355338, %v194_v57 }
 0x235   :  { %v2212_v63 = vmul.f32 0.35355338, %v193_v60  ;;  %v2214_v2 = vpack.i.bf16 %v206_v58, %v205_v61 }
 0x236   :  { %423 = vrot.lane.b32.xlu0 %v2210_v62, %s2083_s18 }
 0x237   :  { %1746 = vmatprep.mubr.msk.f32.mxu1 %vm223_vm5, %v2212_v63  ;;  %1944 = vrot.lane.b32.xlu1 %v2214_v2, %s2084_s19 }
 0x23a   :  { %791 = vrot.lane.b32.xlu0 %v2212_v63, %s2085_s20 }
 0x23b   :  { %1949 = vrot.lane.b32.xlu1 %v2214_v2, %s2086_s21 }
 0x23f   :  { %421 = vrot.lane.b32.xlu1 %v2212_v63, %s2083_s18 }
 0x243   :  { %1954 = vrot.lane.b32.xlu1 %v2214_v2, %s2087_s22 }
 0x247   :  { %793 = vrot.lane.b32.xlu1 %v2210_v62, %s2085_s20 }
 0x2a8   :  { %v424_v20 = vpop.permute.xlu0 %423 }
 0x2a9   :  { %v1945_v3 = vpop.permute.xlu1 %1944 }
 0x2aa   :  { %v1947_v4 = vunpack.i.h.bf16 %v1945_v3  ;;  %v1946_v5 = vunpack.i.l.bf16 %v1945_v3 }
 0x2ac   :  { %v1856_v7 = vpack.c.bf16 %v1947_v4, %v1946_v5  ;;  %v792_v25 = vpop.permute.xlu0 %791 }
 0x2ad   :  { %v1950_v8 = vpop.permute.xlu1 %1949 }
 0x2ae   :  { %v1952_v9 = vunpack.i.h.bf16 %v1950_v8  ;;  %v1951_v10 = vunpack.i.l.bf16 %v1950_v8  ;;  %1858 = vmatprep.subr.msk.bf16.mxu1 %vm2227_vm6, %v1856_v7 }
 0x2af   :  { %1861 = vmatpush3.bf16.xpose.msk.msra.mxu1 %vm2227_vm6, %v1856_v7 }
 0x2b0   :  { %v1866_v11 = vpack.c.bf16 %v1952_v9, %v1951_v10 }
 0x2b1   :  { %v422_v12 = vpop.permute.xlu1 %421 }
 0x2b2   :  { %1868 = vmatprep.subr.msk.bf16.mxu1 %vm2227_vm6, %v1866_v11 }
 0x2b5   :  { %v1955_v13 = vpop.permute.xlu1 %1954 }
 0x2b6   :  { %v1957_v17 = vunpack.i.h.bf16 %v1955_v13  ;;  %v1956_v19 = vunpack.i.l.bf16 %v1955_v13  ;;  %1747 = vmatmul.mubr.msk.f32.vlgmr.msra.gmra.mrb[2].mxu1 %vm223_vm5, %v2210_v62 }
 0x2b7   :  { %1871 = vmatpush3.bf16.xpose.msk.msra.mxu1 %vm2227_vm6, %v1866_v11  ;;  %1760 = vmatprep.mubr.msk.f32.mxu1 %vm223_vm5, %v422_v12 }
 0x2b8   :  { %v1876_v24 = vpack.c.bf16 %v1957_v17, %v1956_v19 }
 0x2b9   :  { %v794_v26 = vpop.permute.xlu1 %793 }
 0x2ba   :  { %1878 = vmatprep.subr.msk.bf16.mxu1 %vm2227_vm6, %v1876_v24 }
 0x2be   :  { %1761 = vmatmul.mubr.msk.f32.vlgmr.msra.gmra.mrb[4].mxu1 %vm223_vm5, %v424_v20 }
 0x2bf   :  { %1881 = vmatpush3.bf16.xpose.msk.msra.mxu1 %vm2227_vm6, %v1876_v24  ;;  %1784 = vmatprep.mubr.msk.f32.mxu1 %vm223_vm5, %v792_v25 }
 0x2c6   :  { %1785 = vmatmul.mubr.msk.f32.vlgmr.msra.gmra.mrb[6].mxu1 %vm223_vm5, %v794_v26 }
 0x389   :  { %v1748_v32 = vpop.f32.mrb[2].mxu1 }
 0x38a   :  { %v306_v33 = vadd.f32 %v1748_v32, %v2255_v30  ;;  %v300_v34 = vpop.f32.mrb[3].mxu1 }
 0x38b   :  { %v301_v35 = vadd.f32 %v300_v34, %v2257_v31 }
 0x38c   :  { %v313_v36 = vsel %vm309_vm9, %v306_v33, -inf }
 0x38d   :  { %314 = vmax.xlane.f32.xlu1 %v313_v36  ;;  %v310_v37 = vsel %vm309_vm9, %v301_v35, -inf }
 0x38e   :  { %311 = vmax.xlane.f32.xlu0 %v310_v37 }
 0x391   :  { %v1762_v38 = vpop.f32.mrb[4].mxu1 }
 0x392   :  { %v503_v39 = vpop.f32.mrb[5].mxu1  ;;  %v509_v41 = vadd.f32 %v1762_v38, %v2255_v30 }
 0x393   :  { %v504_v40 = vadd.f32 %v503_v39, %v2257_v31 }
 0x394   :  { %v515_v44 = vsel %vm309_vm9, %v509_v41, -inf }
 0x395   :  { %v512_v42 = vsel %vm309_vm9, %v504_v40, -inf }
 0x396   :  { %513 = vmax.xlane.f32.xlu0 %v512_v42 }
 0x399   :  { %v1786_v43 = vpop.f32.mrb[6].mxu1 }
 0x39a   :  { %516 = vmax.xlane.f32.xlu0 %v515_v44  ;;  %v873_v45 = vpop.f32.mrb[7].mxu1  ;;  %v879_v20 = vadd.f32 %v1786_v43, %v2255_v30 }
 0x39c   :  { %v885_v24 = vsel %vm309_vm9, %v879_v20, -inf }
 0x3b0   :  { %212 = vrot.lane.b32.xlu0 %v210_v47, %s2089_s1 }
 0x41a   :  { %v315_v48 = vpop.xlane.xlu1 %314 }
 0x41b   :  { %v317_v49 = vsub.f32 %v306_v33, %v315_v48  ;;  %v312_v50 = vpop.xlane.xlu0 %311 }
 0x41c   :  { %v316_v51 = vsub.f32 %v301_v35, %v312_v50 }
 0x41d   :  { %v320_v52 = vmul.f32 1.442695, %v317_v49 }
 0x41e   :  { %v318_v54 = vmul.f32 1.442695, %v316_v51 }
 0x41f   :  { %1991 = vpow2.f32 %v320_v52 }
 0x420   :  { %1993 = vpow2.f32 %v318_v54 }
 0x423   :  { %v514_v55 = vpop.xlane.xlu0 %513 }
 0x424   :  { %v518_v57 = vsub.f32 %v504_v40, %v514_v55 }
 0x426   :  { %v520_v3 = vmul.f32 1.442695, %v518_v57 }
 0x427   :  { %v517_v58 = vpop.xlane.xlu0 %516 }
 0x428   :  { %v519_v60 = vsub.f32 %v509_v41, %v517_v58 }
 0x429   :  { %v2270_v61 = vpop.eup %1991 }
 0x42a   :  { %v1994_v4 = vpop.eup %1993  ;;  %v522_v5 = vmul.f32 1.442695, %v519_v60  ;;  %v325_v7 = vsel %vm309_vm9, %v2270_v61, 0.0 }
 0x42b   :  { %326 = vadd.xlane.f32.xlu1 %v325_v7  ;;  %v213_v8 = vpop.permute.xlu0 %212  ;;  %v322_v11 = vsel %vm309_vm9, %v1994_v4, 0.0 }
 0x42c   :  { %1995 = vpow2.f32 %v522_v5  ;;  %v215_v9 = vadd.f32 %v213_v8, %v2206_v59  ;;  %v216_v10 = vadd.f32 %v2202_v56, %v213_v8  ;;  %v874_v59 = vadd.f32 %v873_v45, %v2257_v31 }
 0x42d   :  { %1997 = vpow2.f32 %v520_v3 }
 0x42e   :  { %v2277_v12 = vpack.i.bf16 %v216_v10, %v215_v9 }
 0x42f   :  { %323 = vadd.xlane.f32.xlu1 %v322_v11 }
 0x430   :  { %1964 = vrot.lane.b32.xlu0 %v2277_v12, %s2090_s27 }
 0x434   :  { %1969 = vrot.lane.b32.xlu0 %v2214_v2, %s2091_s30  ;;  %v882_v2 = vsel %vm309_vm9, %v874_v59, -inf }
 0x436   :  { %v1996_v13 = vpop.eup %1995 }
 0x437   :  { %v1998_v17 = vpop.eup %1997  ;;  %v527_v19 = vsel %vm309_vm9, %v1996_v13, 0.0 }
 0x438   :  { %528 = vadd.xlane.f32.xlu1 %v527_v19  ;;  %1078 = vrot.lane.b32.xlu0 %v2212_v63, %s2092_s6  ;;  %v524_v56 = vsel %vm309_vm9, %v1998_v17, 0.0 }
 0x43c   :  { %525 = vadd.xlane.f32.xlu1 %v524_v56 }
 0x44d   :  { %1959 = vrot.lane.b32.xlu1 %v2277_v12, %s2089_s1 }
 0x451   :  { %1080 = vrot.lane.b32.xlu1 %v2210_v62, %s2092_s6 }
 0x457   :  { %883 = vmax.xlane.f32.xlu0 %v882_v2 }
 0x475   :  { %886 = vmax.xlane.f32.xlu1 %v885_v24 }
 0x486   :  { %707 = vrot.lane.b32.xlu1 %v2162_v14, %s2082_s17 }
 0x48a   :  { %1974 = vrot.lane.b32.xlu1 %v2277_v12, %s2093_s7 }
 0x4a2   :  { %v1965_v63 = vpop.permute.xlu0 %1964 }
 0x4a3   :  { %v1967_v37 = vunpack.i.h.bf16 %v1965_v63  ;;  %v1966_v38 = vunpack.i.l.bf16 %v1965_v63 }
 0x4a5   :  { %v1872_v43 = vpack.c.bf16 %v1967_v37, %v1966_v38 }
 0x4a6   :  { %v1970_v25 = vpop.permute.xlu0 %1969 }
 0x4a7   :  { %v1972_v26 = vunpack.i.h.bf16 %v1970_v25  ;;  %v1971_v62 = vunpack.i.l.bf16 %v1970_v25 }
 0x4a9   :  { %v1886_v27 = vpack.c.bf16 %v1972_v26, %v1971_v62 }
 0x4aa   :  { %v1079_v28 = vpop.permute.xlu0 %1078 }
 0x4ab   :  { %1888 = vmatprep.subr.msk.bf16.mxu1 %vm2227_vm6, %v1886_v27  ;;  %1803 = vmatprep.mubr.msk.f32.mxu1 %vm223_vm5, %v1079_v28 }
 0x4ac   :  { %1891 = vmatpush3.bf16.xpose.msk.msra.mxu1 %vm2227_vm6, %v1886_v27 }
 0x4b8   :  { %v327_v29 = vpop.xlane.xlu1 %326 }
 0x4bc   :  { %v324_v32 = vpop.xlane.xlu1 %323 }
 0x4bd   :  { %1999 = vrcp.f32 %v324_v32 }
 0x4be   :  { %2001 = vrcp.f32 %v327_v29 }
 0x4c5   :  { %v529_v14 = vpop.xlane.xlu1 %528 }
 0x4c7   :  { %v2000_v33 = vpop.eup %1999 }
 0x4c8   :  { %v330_v34 = vmul.f32 %v2000_v33, %v1994_v4  ;;  %v2002_v6 = vpop.eup %2001 }
 0x4c9   :  { %v526_v35 = vpop.xlane.xlu1 %525  ;;  %v331_v45 = vmul.f32 %v2002_v6, %v2270_v61 }
 0x4ca   :  { %2003 = vrcp.f32 %v526_v35  ;;  %1753 = vmatprep.mubr.msk.f32.mxu0 %vm309_vm9, %v330_v34 }
 0x4cb   :  { %2005 = vrcp.f32 %v529_v14 }
 0x4cd   :  { %v1960_v36 = vpop.permute.xlu1 %1959 }
 0x4ce   :  { %v1962_v39 = vunpack.i.h.bf16 %v1960_v36  ;;  %v1961_v40 = vunpack.i.l.bf16 %v1960_v36 }
 0x4d0   :  { %v1862_v41 = vpack.c.bf16 %v1962_v39, %v1961_v40 }
 0x4d1   :  { %v1081_v42 = vpop.permute.xlu1 %1080 }
 0x4d2   :  { %1863 = vmatprep.subr.bf16.mxu0 %v1862_v41  ;;  %1804 = vmatmul.mubr.msk.f32.vlgmr.msra.gmra.mrb[8].mxu1 %vm223_vm5, %v1081_v42 }
 0x4d3   :  { %1865 = vmatpush3.bf16.msra.mxu0 %v1862_v41 }
 0x4d4   :  { %v2004_v44 = vpop.eup %2003  ;;  %1873 = vmatprep.subr.bf16.mxu0 %v1872_v43 }
 0x4d5   :  { %v2006_v46 = vpop.eup %2005  ;;  %v532_v47 = vmul.f32 %v2004_v44, %v1998_v17 }
 0x4d6   :  { %1754 = vmatmul.mubr.msk.f32.vlgmr.msra.gmra.mrb[0].mxu0 %vm309_vm9, %v331_v45  ;;  %v533_v48 = vmul.f32 %v2006_v46, %v1996_v13 }
 0x4d7   :  { %1875 = vmatpush3.bf16.msra.mxu0 %v1872_v43  ;;  %1767 = vmatprep.mubr.msk.f32.mxu0 %vm309_vm9, %v532_v47 }
 0x4da   :  { %1768 = vmatmul.mubr.msk.f32.vlgmr.msra.gmra.mrb[2].mxu0 %vm309_vm9, %v533_v48 }
 0x4e4   :  { %v884_v49 = vpop.xlane.xlu0 %883 }
 0x4e5   :  { %v888_v50 = vsub.f32 %v874_v59, %v884_v49  ;;  %v1367_v49 = vsub.s32 3, %v2183_v21 }
 0x4e7   :  { %v890_v54 = vmul.f32 1.442695, %v888_v50  ;;  %v1368_v50 = vrot.slane %v2186_v23, %v1367_v49 }
 0x502   :  { %v887_v51 = vpop.xlane.xlu1 %886 }
 0x503   :  { %v889_v52 = vsub.f32 %v879_v20, %v887_v51 }
 0x505   :  { %v892_v55 = vmul.f32 1.442695, %v889_v52 }
 0x506   :  { %v708_v4 = vpop.permute.xlu1 %707 }
 0x507   :  { %2007 = vpow2.f32 %v892_v55 }
 0x508   :  { %2009 = vpow2.f32 %v890_v54 }
 0x50a   :  { %v1975_v17 = vpop.permute.xlu1 %1974 }
 0x50b   :  { %v1977_v59 = vunpack.i.h.bf16 %v1975_v17  ;;  %v1976_v2 = vunpack.i.l.bf16 %v1975_v17  ;;  %v42_v17 = vld [vmem:[%s2415_s2 + $0x18] sm:$0xff] }
 0x511   :  { %v2008_v57 = vpop.eup %2007 }
 0x512   :  { %v897_v58 = vsel %vm309_vm9, %v2008_v57, 0.0  ;;  %v2010_v60 = vpop.eup %2009 }
 0x513   :  { %898 = vadd.xlane.f32.xlu0 %v897_v58  ;;  %v894_v61 = vsel %vm309_vm9, %v2010_v60, 0.0 }
 0x517   :  { %895 = vadd.xlane.f32.xlu0 %v894_v61 }
 0x52d   :  { %622 = vrot.lane.b32.xlu0 %v2167_v15, %s2082_s17 }
 0x5a0   :  { %v899_v3 = vpop.xlane.xlu0 %898 }
 0x5a4   :  { %v896_v5 = vpop.xlane.xlu0 %895 }
 0x5a5   :  { %v1805_v7 = vpop.f32.mrb[8].mxu1  ;;  %2011 = vrcp.f32 %v896_v5 }
 0x5a6   :  { %v1166_v8 = vadd.f32 %v1805_v7, %v2255_v30  ;;  %v1160_v9 = vpop.f32.mrb[9].mxu1  ;;  %2013 = vrcp.f32 %v899_v3 }
 0x5a7   :  { %v1161_v10 = vadd.f32 %v1160_v9, %v2257_v31  ;;  %v1882_v31 = vpack.c.bf16 %v1977_v59, %v1976_v2  ;;  %v1512_v2 = vld [vmem:[%s2416_s3] sm:$0xff] }
 0x5a8   :  { %v1172_v11 = vsel %vm309_vm9, %v1166_v8, -inf  ;;  %v623_v13 = vpop.permute.xlu0 %622 }
 0x5a9   :  { %1173 = vmax.xlane.f32.xlu0 %v1172_v11  ;;  %v1755_v19 = vpop.f32.mrb[0].mxu0  ;;  %v1169_v56 = vsel %vm309_vm9, %v1161_v10, -inf  ;;  %1770 = vmatprep.subr.mxu0 %v623_v13 }
 0x5aa   :  { %1170 = vmax.xlane.f32.xlu1 %v1169_v56  ;;  %v412_v15 = vpop.f32.mrb[1].mxu0  ;;  %1771 = vmatpush3.msra.mxu0 %v623_v13  ;;  %v40_v13 = vld [vmem:[%s2415_s2 + $0x8] sm:$0xff] }
 0x5ab   :  { %1775 = vmatprep.subr.mxu0 %v708_v4  ;;  %v1896_v56 = vpack.c.bf16 %v42_v17, %v40_v13 }
 0x5ad   :  { %v1769_v30 = vpop.f32.mrb[2].mxu0  ;;  %1897 = vmatprep.subr.bf16.mxu1 %v1896_v56 }
 0x5ae   :  { %v612_v20 = vpop.f32.mrb[3].mxu0  ;;  %1899 = vmatpush3.bf16.msra.mxu1 %v1896_v56 }
 0x5af   :  { %1772 = vmatprep.mubr.msk.f32.mxu0 %vm223_vm5, %v612_v20  ;;  %v2012_v24 = vpop.eup %2011  ;;  %v1514_v20 = vld [vmem:[%s2416_s3 + $0x10] sm:$0xff] }
 0x5b0   :  { %1773 = vmatmul.mubr.msk.f32.vlgmr.msra.gmra.mrb[4].mxu0 %vm223_vm5, %v1769_v30  ;;  %v2014_v63 = vpop.eup %2013  ;;  %v902_v25 = vmul.f32 %v2012_v24, %v2010_v60  ;;  %v1513_v30 = vld [vmem:[%s2416_s3 + $0x8] sm:$0xff]  ;;  %v1515_v24 = vld [vmem:[%s2416_s3 + $0x18] sm:$0xff] }
 0x5b1   :  { %1776 = vmatpush3.msra.mxu0 %v708_v4  ;;  %1777 = vmatprep.mubr.msk.f32.mxu0 %vm223_vm5, %v412_v15  ;;  %v903_v26 = vmul.f32 %v2014_v63, %v2008_v57  ;;  %v46_v15 = vld [vmem:[%s2415_s2 + $0x38] sm:$0xff]  ;;  %v1908_v63 = vpack.c.bf16 %v1515_v24, %v1514_v20 }
 0x5b2   :  { %1883 = vmatprep.subr.bf16.mxu0 %v1882_v31 }
 0x5b8   :  { %1778 = vmatmul.mubr.msk.f32.vlgmr.msra.gmra.mrb[4].mxu0 %vm223_vm5, %v1755_v19  ;;  %v44_v19 = vld [vmem:[%s2415_s2 + $0x28] sm:$0xff] }
 0x5b9   :  { %1885 = vmatpush3.bf16.msra.mxu0 %v1882_v31  ;;  %1791 = vmatprep.mubr.msk.f32.mxu0 %vm309_vm9, %v902_v25  ;;  %v1900_v59 = vpack.c.bf16 %v46_v15, %v44_v19  ;;  %v1904_v31 = vpack.c.bf16 %v1513_v30, %v1512_v2  ;;  %v1516_v25 = vld [vmem:[%s2416_s3 + $0x20] sm:$0xff] }
 0x5bb   :  { %992 = vrot.lane.b32.xlu1 %v2172_v16, %s2082_s17  ;;  %1901 = vmatprep.subr.bf16.mxu1 %v1900_v59 }
 0x5bc   :  { %1792 = vmatmul.mubr.msk.f32.vlgmr.msra.gmra.mrb[6].mxu0 %vm309_vm9, %v903_v26  ;;  %1903 = vmatpush3.bf16.msra.mxu1 %v1900_v59  ;;  %v1517_v26 = vld [vmem:[%s2416_s3 + $0x28] sm:$0xff] }
 0x5bf   :  { %1279 = vrot.lane.b32.xlu1 %v2179_v18, %s2082_s17 }
 0x636   :  { %v1174_v62 = vpop.xlane.xlu0 %1173 }
 0x637   :  { %v1176_v27 = vsub.f32 %v1166_v8, %v1174_v62  ;;  %v1171_v28 = vpop.xlane.xlu1 %1170  ;;  %v1912_v62 = vpack.c.bf16 %v1517_v26, %v1516_v25 }
 0x638   :  { %v1175_v29 = vsub.f32 %v1161_v10, %v1171_v28 }
 0x639   :  { %v1179_v32 = vmul.f32 1.442695, %v1176_v27 }
 0x63a   :  { %v1177_v14 = vmul.f32 1.442695, %v1175_v29 }
 0x63b   :  { %2015 = vpow2.f32 %v1179_v32  ;;  %v993_v33 = vpop.permute.xlu1 %992 }
 0x63c   :  { %1794 = vmatprep.subr.mxu0 %v993_v33  ;;  %2017 = vpow2.f32 %v1177_v14 }
 0x63d   :  { %1795 = vmatpush3.msra.mxu0 %v993_v33 }
 0x63f   :  { %v1280_v43 = vpop.permute.xlu1 %1279 }
 0x645   :  { %v2016_v34 = vpop.eup %2015 }
 0x646   :  { %v1184_v35 = vsel %vm309_vm9, %v2016_v34, 0.0  ;;  %v2018_v16 = vpop.eup %2017 }
 0x647   :  { %1185 = vadd.xlane.f32.xlu0 %v1184_v35  ;;  %v1181_v36 = vsel %vm309_vm9, %v2018_v16, 0.0 }
 0x64b   :  { %1182 = vadd.xlane.f32.xlu0 %v1181_v36 }
 0x661   :  { %1979 = vrot.lane.b32.xlu0 %v2277_v12, %s2094_s8 }
 0x68f   :  { %v1793_v18 = vpop.f32.mrb[6].mxu0 }
 0x690   :  { %v982_v37 = vpop.f32.mrb[7].mxu0 }
 0x691   :  { %1796 = vmatprep.mubr.msk.f32.mxu0 %vm223_vm5, %v982_v37 }
 0x692   :  { %1797 = vmatmul.mubr.msk.f32.vlgmr.msra.gmra.mrb[4].mxu0 %vm223_vm5, %v1793_v18 }
 0x6d4   :  { %v1186_v38 = vpop.xlane.xlu0 %1185 }
 0x6d5   :  { %2019 = vrcp.f32 %v1186_v38 }
 0x6d8   :  { %v1183_v39 = vpop.xlane.xlu0 %1182 }
 0x6d9   :  { %2021 = vrcp.f32 %v1183_v39 }
 0x6dc   :  { %v1980_v40 = vpop.permute.xlu0 %1979 }
 0x6dd   :  { %v1982_v41 = vunpack.i.h.bf16 %v1980_v40  ;;  %v1981_v6 = vunpack.i.l.bf16 %v1980_v40 }
 0x6df   :  { %v1892_v42 = vpack.c.bf16 %v1982_v41, %v1981_v6  ;;  %v2020_v44 = vpop.eup %2019  ;;  %v48_v6 = vld [vmem:[#allocation2 + $0x8] sm:$0x3] }
 0x6e0   :  { %v1190_v46 = vmul.f32 %v2020_v44, %v2016_v34 }
 0x6e1   :  { %1893 = vmatprep.subr.bf16.mxu0 %v1892_v42 }
 0x6e2   :  { %1895 = vmatpush3.bf16.msra.mxu0 %v1892_v42  ;;  %v1396_v42 = vrot.slane %v48_v6, %v191_v53  ;;  %v1519_v53 = vld [vmem:[%s2416_s3 + $0x38] sm:$0xff] }
 0x6e3   :  { %v2022_v45 = vpop.eup %2021  ;;  %1813 = vmatprep.subr.mxu0 %v1280_v43 }
 0x6e4   :  { %v1189_v12 = vmul.f32 %v2022_v45, %v2018_v16  ;;  %v1422_v45 = vrot.slane %v48_v6, %v199_v22  ;;  %v1427_v22 = vsub.s32 4, %v2183_v21 }
 0x6e6   :  { %1810 = vmatprep.mubr.msk.f32.mxu0 %vm309_vm9, %v1189_v12 }
 0x6e7   :  { %1811 = vmatmul.mubr.msk.f32.vlgmr.msra.gmra.mrb[8].mxu0 %vm309_vm9, %v1190_v46 }
 0x6e8   :  { %1814 = vmatpush3.msra.mxu0 %v1280_v43 }
 0x6e9   :  { %1905 = vmatprep.subr.bf16.mxu0 %v1904_v31 }
 0x7ba   :  { %v1812_v47 = vpop.f32.mrb[8].mxu0 }
 0x7bb   :  { %v1269_v48 = vpop.f32.mrb[9].mxu0 }
 0x7bc   :  { %1815 = vmatprep.mubr.msk.f32.mxu0 %vm223_vm5, %v1269_v48 }
 0x7bd   :  { %1816 = vmatmul.mubr.msk.f32.vlgmr.msra.gmra.mrb[4].mxu0 %vm223_vm5, %v1812_v47 }
 0x7be   :  { %1907 = vmatpush3.bf16.msra.mxu0 %v1904_v31 }
 0x7bf   :  { %1909 = vmatprep.subr.bf16.mxu0 %v1908_v63 }
 0x7c2   :  { %1911 = vmatpush3.bf16.msra.mxu0 %v1908_v63 }
 0x7c3   :  { %1913 = vmatprep.subr.bf16.mxu0 %v1912_v62 }
 0x7c6   :  { %1915 = vmatpush3.bf16.msra.mxu0 %v1912_v62 }
 0x890   :  { %v1817_v51 = vpop.f32.mrb[4].mxu0 }
 0x891   :  { %v1370_v52 = vadd.f32 %v1817_v51, %v1368_v50  ;;  %v1354_v54 = vpop.f32.mrb[5].mxu0  ;;  %v1518_v51 = vld [vmem:[%s2416_s3 + $0x30] sm:$0xff]  ;;  %s2095_s3 = smov [#allocation5]  }
 0x892   :  { %v1369_v55 = vadd.f32 %v1368_v50, %v1354_v54  ;;  %v1428_v54 = vrot.slane %v2186_v23, %v1427_v22  ;;  %s1615_s6 = sshll.u32 %s2095_s3, 4  ;;  %s1616_s6 = int_to_ptr.vmem [resolvable:$true] %s1615_s6 }
 0x893   :  { %v2335_v57 = vadd.f32 %v1370_v52, %v2149_v1  ;;  %v1916_v52 = vpack.c.bf16 %v1519_v53, %v1518_v51  ;;  %s2053_s7 = scalar_lea.vmem %s1616_s6, 256  ;;  %p2058_p9 = scmp.lt.s32.totalorder %s1616_s6, %s1616_s6 }
 0x894   :  { %v2338_v58 = vadd.f32 %v1369_v55, %v2144_v0  ;;  %p2054_p8 = scmp.ne.s32.totalorder %s1616_s6, %s2053_s7  ;;  %p2059_p10 = scmp.lt.s32.totalorder %s2053_s7, %s2053_s7 }
 0x895   :  { %v1376_v60 = vsel %vm53_vm0, %v2335_v57, 0.0  ;;  %1917 = vmatprep.subr.bf16.mxu0 %v1916_v52 }
 0x896   :  { %1377 = vadd.xlane.f32.xlu0 %v1376_v60  ;;  %v1373_v61 = vsel %vm53_vm0, %v2338_v58, 0.0  ;;  %1919 = vmatpush3.bf16.msra.mxu0 %v1916_v52  ;;  %p2060_p11 = por %p2059_p10, %p2058_p9 }
 0x897   :  { %1374 = vadd.xlane.f32.xlu1 %v1373_v61 }
 0x898   :  { %p2061_p12 = pnand %p2060_p11, %p2054_p8 }
 0x923   :  { %v1378_v3 = vpop.xlane.xlu0 %1377 }
 0x924   :  { %v1380_v4 = vmul.f32 0.03125, %v1378_v3  ;;  %v1375_v5 = vpop.xlane.xlu1 %1374 }
 0x925   :  { %v1379_v7 = vmul.f32 0.03125, %v1375_v5 }
 0x926   :  { %v1382_v8 = vsub.f32 %v2335_v57, %v1380_v4 }
 0x927   :  { %v1381_v1 = vsub.f32 %v2338_v58, %v1379_v7  ;;  %v1522_v7 = vsub.s32 5, %v2183_v21 }
 0x928   :  { %v1384_v9 = vmul.f32 %v1382_v8, %v1382_v8  ;;  %v1398_v43 = vmul.f32 %v1396_v42, %v1382_v8 }
 0x929   :  { %v1383_v10 = vmul.f32 %v1381_v1, %v1381_v1  ;;  %v1397_v12 = vmul.f32 %v1396_v42, %v1381_v1  ;;  %v1523_v8 = vrot.slane %v2186_v23, %v1522_v7 }
 0x92a   :  { %v1388_v0 = vsel %vm53_vm0, %v1384_v9, 0.0 }
 0x92b   :  { %1389 = vadd.xlane.f32.xlu1 %v1388_v0  ;;  %v1385_v11 = vsel %vm53_vm0, %v1383_v10, 0.0 }
 0x92c   :  { %1386 = vadd.xlane.f32.xlu0 %v1385_v11 }
 0x9b8   :  { %v1390_v27 = vpop.xlane.xlu1 %1389 }
 0x9b9   :  { %v1392_v28 = vmul.f32 0.032258064, %v1390_v27  ;;  %v1387_v29 = vpop.xlane.xlu0 %1386 }
 0x9ba   :  { %v1391_v32 = vmul.f32 0.032258064, %v1387_v29 }
 0x9bb   :  { %2023 = vrsqrt.f32 %v1392_v28  ;;  %vm1408_vm10 = vcmp.eq.f32.partialorder %v1392_v28, inf  ;;  %v1411_v35 = vand.u32 2147483648, %v1392_v28  ;;  %vm1410_vm11 = vcmp.eq.f32.partialorder %v1392_v28, 0.0 }
 0x9bc   :  { %2025 = vrsqrt.f32 %v1391_v32  ;;  %vm1401_vm12 = vcmp.eq.f32.partialorder %v1391_v32, inf  ;;  %v1404_v18 = vand.u32 2147483648, %v1391_v32  ;;  %vm1403_vm13 = vcmp.eq.f32.partialorder %v1391_v32, 0.0 }
 0x9c5   :  { %v2024_v14 = vpop.eup %2023 }
 0x9c6   :  { %v2026_v33 = vpop.eup %2025  ;;  %v1407_v34 = vmul.f32 %v2024_v14, %v1392_v28 }
 0x9c7   :  { %v1400_v16 = vmul.f32 %v2026_v33, %v1391_v32 }
 0x9c8   :  { %v1409_v36 = vsel %vm1408_vm10, %v1392_v28, %v1407_v34 }
 0x9c9   :  { %v1412_v37 = vsel %vm1410_vm11, %v1411_v35, %v1409_v36  ;;  %v1402_v38 = vsel %vm1401_vm12, %v1391_v32, %v1400_v16 }
 0x9ca   :  { %v1414_v39 = vadd.f32 1e-06, %v1412_v37  ;;  %v1405_v40 = vsel %vm1403_vm13, %v1404_v18, %v1402_v38 }
 0x9cb   :  { %v1413_v41 = vadd.f32 1e-06, %v1405_v40 }
 0x9cc   :  { %2027 = vrcp.f32 %v1414_v39 }
 0x9cd   :  { %2029 = vrcp.f32 %v1413_v41 }
 0x9d6   :  { %v2028_v44 = vpop.eup %2027 }
 0x9d7   :  { %v2030_v46 = vpop.eup %2029  ;;  %v1418_v47 = vmul.f32 %v2028_v44, %v1398_v43 }
 0x9d8   :  { %v1416_v48 = vmul.f32 %v2030_v46, %v1397_v12 }
 0x9d9   :  { %v1424_v50 = vadd.f32 %v1422_v45, %v1418_v47 }
 0x9da   :  { %v1423_v49 = vadd.f32 %v1422_v45, %v1416_v48 }
 0x9dc   :  { %1826 = vmatprep.mubr.msk.f32.mxu1 %vm53_vm0, %v1423_v49 }
 0x9dd   :  { %1827 = vmatmul.mubr.msk.f32.vlgmr.msra.gmra.mrb[10].mxu1 %vm53_vm0, %v1424_v50 }
 0xab0   :  { %v1828_v55 = vpop.f32.mrb[10].mxu1 }
 0xab1   :  { %v1507_v60 = vadd.f32 %v1828_v55, %v1428_v54  ;;  %v1501_v61 = vpop.f32.mrb[11].mxu1 }
 0xab2   :  { %v1502_v3 = vadd.f32 %v1501_v61, %v1428_v54 }
 0xab3   :  { %v1511_v5 = vmax.f32 %v1507_v60, 0.0 }
 0xab4   :  { %v1510_v4 = vmax.f32 %v1502_v3, 0.0 }
 0xab6   :  { %1845 = vmatprep.mubr.msk.f32.mxu0 %vm1524_vm14, %v1510_v4 }
 0xab7   :  { %1846 = vmatmul.mubr.msk.f32.vlgmr.msra.gmra.mrb[10].mxu0 %vm1524_vm14, %v1511_v5 }
 0xb8a   :  { %v1847_v1 = vpop.f32.mrb[10].mxu0 }
 0xb8b   :  { %v1603_v9 = vadd.f32 %v1847_v1, %v1523_v8  ;;  %v1597_v10 = vpop.f32.mrb[11].mxu0 }
 0xb8c   :  { %v1598_v0 = vadd.f32 %v1597_v10, %v1523_v8 }
 0xb8d   :  { %v1607_v11 = vadd.f32 %v1603_v9, %v2335_v57 }
 0xb8e   :  { %v1606_v13 = vadd.f32 %v1598_v0, %v2338_v58 }
 0xb8f   :  { %1609 = vst.msk [vmem:[#allocation5 + $0x8] sm:$0xff] %vm53_vm0, %v1607_v11 }
 0xb90   :  { %1608 = vst.msk [vmem:[#allocation5] sm:$0xff] %vm53_vm0, %v1606_v13 }
 0xb91   :  { %2064 = shalt.err (!%p2061_p12)
}
 0xb92   :  { %s2065_s10 = scalar_lea.hbm %s2418_s5, 256 }
 0xb93   :  { %p2066_p13 = scmp.ne.s32.totalorder %s2418_s5, %s2065_s10  ;;  %p2069_p0 = scmp.lt.u32.totalorder %s2065_s10, %s2418_s5 }
 0xb95   :  { %p2071_p1 = pnand %p2069_p0, %p2066_p13 }
 0xb97   :  { %2074 = shalt.err (!%p2071_p1)
}
 0xb98   :  { %1621 = dma.vmem_to_hbm [thread:$0]  %s1616_s6, 256, %s2418_s5, [#allocation4], %s2080_s28, %s2080_s28, %s2081_s29  }
 0xb99   :  { %2077 = dma.done.wait [#allocation4], 256  }
 0xb9a   :  { %2078 = vsyncadd [#allocation4], 4294967040 }
 0xb9b   :  { %1625 = vsyncpa [#allocation3], 1 }
 0xb9c   :  { %1626 = vsyncpa [#allocation4], 1 }

</bundles_post_ra>
